<compile_context>
chip_gen: v5e
topology: v5e:2x2
jax: 0.10.0
libtpu: 0.0.40
codegen_flags: <defaults>
</compile_context>

<pallas_src>
import functools

import jax
import jax.numpy as jnp
from jax.experimental import pallas as pl
from jax.experimental.pallas import tpu as pltpu

_SUBLANE = 8                    # f32 sublane granularity for the batch axis
_MAX_SINGLE_TC_TILE = 4096      # rows/step cap on single-TC chips (VMEM-safe)
_TARGET_ROWS_PER_STEP = 1024    # target rows/step when splitting for dual-TC


def _round_up(x, m):
    return (x + m - 1) // m * m


def _dual_tensorcore():
    """True on chips with two TensorCores sharing the grid (v7x)."""
    try:
        return "v7" in jax.devices()[0].device_kind.lower()
    except Exception:  # pragma: no cover - be conservative
        return False


def _choose_batch_tile(B):
    """Pick a batch tile: 1 big step on single-TC chips, even >=2 steps on v7x."""
    B8 = _round_up(max(B, 1), _SUBLANE)
    if _dual_tensorcore():
        if B8 <= 512:
            # Too small to be worth splitting across cores.
            return B
        nsteps = pl.cdiv(B8, _TARGET_ROWS_PER_STEP)
        nsteps = max(2, nsteps + (nsteps % 2))          # even, >= 2
        return _round_up(pl.cdiv(B8, nsteps), _SUBLANE)
    # Single TensorCore (v5e / v6e): grid steps are a serial loop, so use one
    # big step whenever it fits comfortably in scoped VMEM (it always does at
    # these shapes; cap defensively for huge replay batches).
    if B8 <= _MAX_SINGLE_TC_TILE:
        return B
    return _MAX_SINGLE_TC_TILE


def _mlp_kernel(x_ref, w1_ref, b1_ref, w2_ref, b2_ref, o_ref):
    # hidden = relu(x @ W1 + b1), accumulated in f32.
    h = jnp.dot(x_ref[...], w1_ref[...], preferred_element_type=jnp.float32)
    h = jnp.maximum(h + b1_ref[...], 0.0)               # (TB, H) + (1, H)
    # out = hidden @ W2 + b2 (D_out stays unpadded; masked store is cheap).
    o = jnp.dot(h.astype(w2_ref.dtype), w2_ref[...],
                preferred_element_type=jnp.float32)
    o_ref[...] = (o + b2_ref[...]).astype(o_ref.dtype)


@functools.partial(jax.jit, static_argnames=("batch_tile", "use_bf16"))
def qnetwork_forward(x, w1, b1, w2, b2, *, batch_tile=None, use_bf16=False):
    """Fused MLP forward.

    x:(B,D_in)  w1:(D_in,H)  b1:(1,H)  w2:(H,D_out)  b2:(1,D_out)  -> (B,D_out) f32
    """
    B, D_in = x.shape
    H = w1.shape[1]
    D_out = w2.shape[1]

    # --- optional bf16 inputs (f32 accumulation kept inside the kernel) -----
    if use_bf16:
        x = x.astype(jnp.bfloat16)
        w1 = w1.astype(jnp.bfloat16)
        w2 = w2.astype(jnp.bfloat16)

    # --- choose a batch tile -------------------------------------------------
    if batch_tile is None:
        batch_tile = _choose_batch_tile(B)
    if batch_tile >= B:
        batch_tile = B                       # single step; full-dim block is legal
    else:
        batch_tile = _round_up(batch_tile, _SUBLANE)
    grid = (pl.cdiv(B, batch_tile),)         # partial edge block handled by Pallas

    # --- advisory cost estimate ---------------------------------------------
    flops = 2 * B * (D_in * H + H * D_out)
    bytes_accessed = (
        x.size * jnp.dtype(x.dtype).itemsize
        + w1.size * jnp.dtype(w1.dtype).itemsize
        + b1.size * jnp.dtype(b1.dtype).itemsize
        + w2.size * jnp.dtype(w2.dtype).itemsize
        + b2.size * jnp.dtype(b2.dtype).itemsize
        + B * D_out * 4
    )

    out = pl.pallas_call(
        _mlp_kernel,
        out_shape=jax.ShapeDtypeStruct((B, D_out), jnp.float32),
        grid_spec=pltpu.PrefetchScalarGridSpec(
            num_scalar_prefetch=0,
            grid=grid,
            in_specs=[
                # x: tile over batch, full feature dim (streams with the grid).
                pl.BlockSpec((batch_tile, D_in), lambda i: (i, 0)),
                # weights / biases: constant block index -> stay VMEM-resident.
                pl.BlockSpec((D_in, H), lambda i: (0, 0)),
                pl.BlockSpec((1, H), lambda i: (0, 0)),
                pl.BlockSpec((H, D_out), lambda i: (0, 0)),
                pl.BlockSpec((1, D_out), lambda i: (0, 0)),
            ],
            out_specs=pl.BlockSpec((batch_tile, D_out), lambda i: (i, 0)),
        ),
        compiler_params=pltpu.CompilerParams(
            dimension_semantics=("parallel",)),
        cost_estimate=pl.CostEstimate(
            flops=flops, transcendentals=0, bytes_accessed=bytes_accessed),
    )(x, w1, b1, w2, b2)
    return out


def init_qnetwork_params(key, input_dim, output_dim, hidden_dim=128):
    """Deterministic init mimicking PyTorch nn.Linear default (uniform +-1/sqrt(fan_in))."""
    k1, k2, k3, k4 = jax.random.split(key, 4)
    lim1 = 1.0 / jnp.sqrt(jnp.float32(input_dim))
    lim2 = 1.0 / jnp.sqrt(jnp.float32(hidden_dim))
    w1 = jax.random.uniform(k1, (input_dim, hidden_dim), jnp.float32, -lim1, lim1)
    b1 = jax.random.uniform(k2, (1, hidden_dim), jnp.float32, -lim1, lim1)
    w2 = jax.random.uniform(k3, (hidden_dim, output_dim), jnp.float32, -lim2, lim2)
    b2 = jax.random.uniform(k4, (1, output_dim), jnp.float32, -lim2, lim2)
    return w1, b1, w2, b2


def qnetwork_reference(x, w1, b1, w2, b2):
    h = jnp.maximum(x @ w1 + b1, 0.0)
    return h @ w2 + b2


if __name__ == "__main__":
    key = jax.random.PRNGKey(0)
    kx, kp, kx2 = jax.random.split(key, 3)

    # Small shapes consistent with the module: state dim 32, 128 hidden, 8 actions.
    batch, input_dim, hidden_dim, output_dim = 16, 32, 128, 8
    x = jax.random.normal(kx, (batch, input_dim), jnp.float32)
    w1, b1, w2, b2 = init_qnetwork_params(kp, input_dim, output_dim, hidden_dim)

    # Small batch: single grid step (block == full batch dim).
    out = jax.block_until_ready(qnetwork_forward(x, w1, b1, w2, b2))
    ref = qnetwork_reference(x, w1, b1, w2, b2)
    assert out.shape == (batch, output_dim)
    assert jnp.allclose(out, ref, atol=1e-5, rtol=1e-5), "mismatch vs pure-JAX reference"

    # Larger replay-buffer style batch: auto tiling (1 step on v5e/v6e, even
    # multi-step grid on v7x), no materialized padding of x.
    big_batch = 3000
    xb = jax.random.normal(kx2, (big_batch, input_dim), jnp.float32)
    out_b = jax.block_until_ready(qnetwork_forward(xb, w1, b1, w2, b2))
    ref_b = qnetwork_reference(xb, w1, b1, w2, b2)
    assert out_b.shape == (big_batch, output_dim)
    assert jnp.allclose(out_b, ref_b, atol=1e-5, rtol=1e-5), "mismatch (large batch)"

    # Force the multi-step grid with a partial (masked) edge block on every
    # chip generation: 3000 rows / 768-row tiles -> grid=4, last block partial.
    out_c = jax.block_until_ready(
        qnetwork_forward(xb, w1, b1, w2, b2, batch_tile=768))
    assert out_c.shape == (big_batch, output_dim)
    assert jnp.allclose(out_c, ref_b, atol=1e-5, rtol=1e-5), "mismatch (edge block)"

    print("KERNEL_OK")
</pallas_src>

<mosaic_0001>
module attributes {stable_mosaic.version = 11 : i64} {
  func.func @_mlp_kernel(%arg0: i32, %arg1: memref<16x32xf32, #tpu.memory_space<vmem>>, %arg2: memref<32x128xf32, #tpu.memory_space<vmem>>, %arg3: memref<1x128xf32, #tpu.memory_space<vmem>>, %arg4: memref<128x8xf32, #tpu.memory_space<vmem>>, %arg5: memref<1x8xf32, #tpu.memory_space<vmem>>, %arg6: memref<16x8xf32, #tpu.memory_space<vmem>>) attributes {dimension_semantics = [#tpu.dimension_semantics<parallel>], iteration_bounds = array<i64: 1>, scalar_prefetch = 0 : i64, scratch_operands = 0 : i64, tpu.core_type = #tpu.core_type<tc>, window_params = [{transform_indices = @transform_0, window_bounds = array<i64: 16, 32>}, {pipeline_mode = #tpu.pipeline_mode<synchronous>, transform_indices = @transform_1, window_bounds = array<i64: 32, 128>}, {pipeline_mode = #tpu.pipeline_mode<synchronous>, transform_indices = @transform_2, window_bounds = array<i64: 1, 128>}, {pipeline_mode = #tpu.pipeline_mode<synchronous>, transform_indices = @transform_3, window_bounds = array<i64: 128, 8>}, {pipeline_mode = #tpu.pipeline_mode<synchronous>, transform_indices = @transform_4, window_bounds = array<i64: 1, 8>}, {transform_indices = @transform_5, window_bounds = array<i64: 16, 8>}]} {
    %c0 = arith.constant 0 : index
    %c0_0 = arith.constant 0 : index
    %0 = vector.load %arg1[%c0, %c0_0] : memref<16x32xf32, #tpu.memory_space<vmem>>, vector<16x32xf32>
    %c0_1 = arith.constant 0 : index
    %c0_2 = arith.constant 0 : index
    %1 = vector.load %arg2[%c0_1, %c0_2] : memref<32x128xf32, #tpu.memory_space<vmem>>, vector<32x128xf32>
    %cst = arith.constant dense<0.000000e+00> : vector<16x128xf32>
    %2 = tpu.matmul %0, %1, %cst {dimension_numbers = #tpu.dot_dimension_numbers<[1], [0], [0], [1], [0, 0, 1, 1], [], []>} : vector<16x32xf32>, vector<32x128xf32>, vector<16x128xf32> -> vector<16x128xf32>
    %c0_3 = arith.constant 0 : index
    %c0_4 = arith.constant 0 : index
    %3 = vector.load %arg3[%c0_3, %c0_4] : memref<1x128xf32, #tpu.memory_space<vmem>>, vector<1x128xf32>
    %4 = vector.broadcast %3 : vector<1x128xf32> to vector<16x128xf32>
    %5 = arith.addf %2, %4 : vector<16x128xf32>
    %cst_5 = arith.constant 0.000000e+00 : f32
    %6 = vector.broadcast %cst_5 : f32 to vector<16x128xf32>
    %7 = arith.maximumf %5, %6 : vector<16x128xf32>
    %c0_6 = arith.constant 0 : index
    %c0_7 = arith.constant 0 : index
    %8 = vector.load %arg4[%c0_6, %c0_7] : memref<128x8xf32, #tpu.memory_space<vmem>>, vector<128x8xf32>
    %cst_8 = arith.constant dense<0.000000e+00> : vector<16x8xf32>
    %9 = tpu.matmul %7, %8, %cst_8 {dimension_numbers = #tpu.dot_dimension_numbers<[1], [0], [0], [1], [0, 0, 1, 1], [], []>} : vector<16x128xf32>, vector<128x8xf32>, vector<16x8xf32> -> vector<16x8xf32>
    %c0_9 = arith.constant 0 : index
    %c0_10 = arith.constant 0 : index
    %10 = vector.load %arg5[%c0_9, %c0_10] : memref<1x8xf32, #tpu.memory_space<vmem>>, vector<1x8xf32>
    %11 = vector.broadcast %10 : vector<1x8xf32> to vector<16x8xf32>
    %12 = arith.addf %9, %11 : vector<16x8xf32>
    %c0_11 = arith.constant 0 : index
    %c0_12 = arith.constant 0 : index
    %13 = vector.load %arg6[%c0_11, %c0_12] : memref<16x8xf32, #tpu.memory_space<vmem>>, vector<16x8xf32>
    tpu.vector_store %arg6[%c0_11, %c0_12], %12 {strides = array<i32>} : memref<16x8xf32, #tpu.memory_space<vmem>>, vector<16x8xf32>,
    return
  }
  func.func @transform_0(%arg0: i32) -> (i32, i32) {
    %c0_i32 = arith.constant 0 : i32
    %c0_i32_0 = arith.constant 0 : i32
    return %arg0, %c0_i32 : i32, i32
  }
  func.func @transform_1(%arg0: i32) -> (i32, i32) {
    %c0_i32 = arith.constant 0 : i32
    %c0_i32_0 = arith.constant 0 : i32
    %c0_i32_1 = arith.constant 0 : i32
    return %c0_i32, %c0_i32_0 : i32, i32
  }
  func.func @transform_2(%arg0: i32) -> (i32, i32) {
    %c0_i32 = arith.constant 0 : i32
    %c0_i32_0 = arith.constant 0 : i32
    %c0_i32_1 = arith.constant 0 : i32
    return %c0_i32, %c0_i32_0 : i32, i32
  }
  func.func @transform_3(%arg0: i32) -> (i32, i32) {
    %c0_i32 = arith.constant 0 : i32
    %c0_i32_0 = arith.constant 0 : i32
    %c0_i32_1 = arith.constant 0 : i32
    return %c0_i32, %c0_i32_0 : i32, i32
  }
  func.func @transform_4(%arg0: i32) -> (i32, i32) {
    %c0_i32 = arith.constant 0 : i32
    %c0_i32_0 = arith.constant 0 : i32
    %c0_i32_1 = arith.constant 0 : i32
    return %c0_i32, %c0_i32_0 : i32, i32
  }
  func.func @transform_5(%arg0: i32) -> (i32, i32) {
    %c0_i32 = arith.constant 0 : i32
    %c0_i32_0 = arith.constant 0 : i32
    return %arg0, %c0_i32 : i32, i32
  }
}

</mosaic_0001>

<bundles_post_ra>
// kernel: qnetwork_forward.1
= control target key start
LH: loop header
LB: loop body
LE: loop exit
PB: predicated region body
PF: predicated region fallthrough
CT: control target
= control target key end

     0   :  { %vm30_vm0 = vcmask 261120   ;;  %vm105_vm1 = vcmask 64512   ;;  %s242_s1 = inlined_call_operand.vmem [shape: f32[32,128], index: 1, kind: input, shape index: {}]   ;;  %s243_s3 = inlined_call_operand.vmem [shape: f32[128,8], index: 3, kind: input, shape index: {}]   ;;  %s244_s0 = inlined_call_operand.vmem [shape: f32[16,32], index: 0, kind: input, shape index: {}]   ;;  %s245_s2 = inlined_call_operand.vmem [shape: f32[1,128], index: 2, kind: input, shape index: {}]   ;;  %s246_s4 = inlined_call_operand.vmem [shape: f32[1,8], index: 4, kind: input, shape index: {}]   ;;  %s247_s5 = inlined_call_operand.vmem [shape: f32[16,8], index: 5, kind: output, shape index: {}]  }
   0x1   :  { %v25_v0 = vld [vmem:[%s242_s1 + $0x18] sm:$0xff]  ;;  %v24_v1 = vld [vmem:[%s242_s1 + $0x10] sm:$0xff]  ;;  %v23_v2 = vld [vmem:[%s242_s1 + $0x8] sm:$0xff] }
   0x2   :  { %49 = vmatpush.msra.mxu0 %v25_v0  ;;  %v77_v3 = vld [vmem:[%s243_s3 + $0x78] sm:$0xff]  ;;  %v76_v4 = vld [vmem:[%s243_s3 + $0x70] sm:$0xff]  ;;  %v22_v5 = vld [vmem:[%s242_s1] sm:$0xff] }
   0x3   :  { %82 = vmatpush.msra.mxu1 %v77_v3  ;;  %v75_v6 = vld [vmem:[%s243_s3 + $0x68] sm:$0xff]  ;;  %114 = vmatpush.msra.mxu2 %v77_v3  ;;  %v20_v7 = vld [vmem:[%s244_s0] sm:$0xff]  ;;  %v73_v9 = vld [vmem:[%s243_s3 + $0x58] sm:$0xff] }
   0x4   :  { %50 = vmatpush.msra.mxu0 %v24_v1  ;;  %v74_v8 = vld [vmem:[%s243_s3 + $0x60] sm:$0xff]  ;;  %v72_v10 = vld [vmem:[%s243_s3 + $0x50] sm:$0xff]  ;;  %v71_v11 = vld [vmem:[%s243_s3 + $0x48] sm:$0xff] }
   0x5   :  { %83 = vmatpush.msra.mxu1 %v76_v4  ;;  %115 = vmatpush.msra.mxu2 %v76_v4  ;;  %v21_v12 = vld [vmem:[%s244_s0 + $0x8] sm:$0xff]  ;;  %v70_v13 = vld [vmem:[%s243_s3 + $0x40] sm:$0xff]  ;;  %v69_v14 = vld [vmem:[%s243_s3 + $0x38] sm:$0xff] }
   0x6   :  { %51 = vmatpush.msra.mxu0 %v23_v2  ;;  %v68_v15 = vld [vmem:[%s243_s3 + $0x30] sm:$0xff]  ;;  %v67_v16 = vld [vmem:[%s243_s3 + $0x28] sm:$0xff]  ;;  %v66_v17 = vld [vmem:[%s243_s3 + $0x20] sm:$0xff] }
   0x7   :  { %84 = vmatpush.msra.mxu1 %v75_v6  ;;  %116 = vmatpush.msra.mxu2 %v75_v6  ;;  %v65_v18 = vld [vmem:[%s243_s3 + $0x18] sm:$0xff]  ;;  %v64_v19 = vld [vmem:[%s243_s3 + $0x10] sm:$0xff]  ;;  %v63_v20 = vld [vmem:[%s243_s3 + $0x8] sm:$0xff] }
   0x8   :  { %52 = vmatpush.msra.mxu0 %v22_v5  ;;  %v62_v21 = vld [vmem:[%s243_s3] sm:$0xff] }
   0x9   :  { %112 = vmatmul.msk.f32.vlgmr.msra.gmra.mxu0 %vm30_vm0, %v20_v7  ;;  %85 = vmatpush.msra.mxu1 %v74_v8  ;;  %v130_v22 = vld [vmem:[%s245_s2] ss:$0 sm:$0xff] }
   0xa   :  { %117 = vmatpush.msra.mxu2 %v74_v8  ;;  %v131_v29 = vld [vmem:[%s246_s4] ss:$0 sm:$0xff] }
   0xb   :  { %86 = vmatpush.msra.mxu1 %v73_v9 }
   0xc   :  { %118 = vmatpush.msra.mxu2 %v73_v9 }
   0xd   :  { %87 = vmatpush.msra.mxu1 %v72_v10 }
   0xe   :  { %119 = vmatpush.msra.mxu2 %v72_v10 }
   0xf   :  { %88 = vmatpush.msra.mxu1 %v71_v11 }
  0x10   :  { %120 = vmatpush.msra.mxu2 %v71_v11 }
  0x11   :  { %113 = vmatmul.msk.f32.gmra.mxu0 %vm30_vm0, %v21_v12  ;;  %89 = vmatpush.msra.mxu1 %v70_v13 }
  0x12   :  { %121 = vmatpush.msra.mxu2 %v70_v13 }
  0x13   :  { %90 = vmatpush.msra.mxu1 %v69_v14 }
  0x14   :  { %122 = vmatpush.msra.mxu2 %v69_v14 }
  0x15   :  { %91 = vmatpush.msra.mxu1 %v68_v15 }
  0x16   :  { %123 = vmatpush.msra.mxu2 %v68_v15 }
  0x17   :  { %92 = vmatpush.msra.mxu1 %v67_v16 }
  0x18   :  { %124 = vmatpush.msra.mxu2 %v67_v16 }
  0x19   :  { %93 = vmatpush.msra.mxu1 %v66_v17 }
  0x1a   :  { %125 = vmatpush.msra.mxu2 %v66_v17 }
  0x1b   :  { %94 = vmatpush.msra.mxu1 %v65_v18 }
  0x1c   :  { %126 = vmatpush.msra.mxu2 %v65_v18 }
  0x1d   :  { %95 = vmatpush.msra.mxu1 %v64_v19 }
  0x1e   :  { %127 = vmatpush.msra.mxu2 %v64_v19 }
  0x1f   :  { %96 = vmatpush.msra.mxu1 %v63_v20 }
  0x20   :  { %128 = vmatpush.msra.mxu2 %v63_v20 }
  0x21   :  { %97 = vmatpush.msra.mxu1 %v62_v21 }
  0x22   :  { %129 = vmatpush.msra.mxu2 %v62_v21 }
  0x86   :  { %v54_v23 = vpop.f32.mrf.mxu0 }
  0x87   :  { %v55_v24 = vadd.f32 %v130_v22, %v54_v23 }
  0x89   :  { %v60_v25 = vmax.f32 %v55_v24, 0.0 }
  0x8b   :  { %98 = vmatmul.f32.vlgmr.msra.gmra.mxu1 %v60_v25 }
  0x8e   :  { %v57_v26 = vpop.f32.mrf.mxu0 }
  0x8f   :  { %v58_v27 = vadd.f32 %v130_v22, %v57_v26 }
  0x91   :  { %v61_v28 = vmax.f32 %v58_v27, 0.0 }
  0x93   :  { %101 = vmatmul.f32.vlgmr.msra.gmra.mxu2 %v61_v28 }
 0x108   :  { %v99_v30 = vpop.f32.mrf.mxu1 }
 0x109   :  { %v100_v31 = vadd.f32 %v131_v29, %v99_v30 }
 0x10b   :  { %106 = vst.msk [vmem:[%s247_s5] sm:$0xff] %vm105_vm1, %v100_v31 }
 0x116   :  { %v102_v32 = vpop.f32.mrf.mxu2 }
 0x117   :  { %v103_v33 = vadd.f32 %v131_v29, %v102_v32 }
 0x119   :  { %107 = vst.msk [vmem:[%s247_s5 + $0x8] sm:$0xff] %vm105_vm1, %v103_v33 }

</bundles_post_ra>
